<compile_context>
chip_gen: v7x
topology: tpu7x:2x2x1
jax: 0.10.0
libtpu: 0.0.40
codegen_flags: <defaults>
</compile_context>

<pallas_src>
import jax
import jax.numpy as jnp
from jax.experimental import pallas as pl
from jax.experimental.pallas import tpu as pltpu


def _round_up(x: int, n: int) -> int:
    return ((x + n - 1) // n) * n


def _cdiv(a: int, b: int) -> int:
    return (a + b - 1) // b


def _vmem_budget_bytes() -> int:
    """~85% of the chip's VMEM capacity (v5e/v6e 128 MiB, v7x 64 MiB)."""
    try:
        cap = int(pltpu.get_tpu_info().vmem_capacity_bytes)
    except Exception:
        cap = 64 * 1024 * 1024  # conservative fallback, valid on all gens
    return int(0.85 * cap)


def _const_spec(block_shape):
    """BlockSpec for an operand whose block index never changes: fetched once
    and kept single-buffered (pl.Buffered(1)) instead of double-buffered."""
    idx = lambda *args: (0,) * len(block_shape)
    try:
        return pl.BlockSpec(block_shape, idx, pipeline_mode=pl.Buffered(1))
    except Exception:  # older jax without pipeline_mode -> default buffering
        return pl.BlockSpec(block_shape, idx)


# ----------------------------- kernels --------------------------------------


def _ffn_kernel_fused(x_ref, w1_ref, b1_ref, w2_ref, b2_ref, o_ref):
    # x_ref: (TM, d_in_p) | w1_ref: (d_in_p, d_hid_p) | b1_ref: (1, d_hid_p) f32
    # w2_ref: (d_hid_p, d_in_p) | b2_ref: (1, d_in_p) f32
    h = jnp.dot(x_ref[...], w1_ref[...], preferred_element_type=jnp.float32)
    h = jnp.maximum(h + b1_ref[...], 0.0)             # fused bias + ReLU (f32)
    y = jnp.dot(h.astype(w2_ref.dtype), w2_ref[...],
                preferred_element_type=jnp.float32)
    o_ref[...] = (y + b2_ref[...]).astype(o_ref.dtype)


def _ffn_kernel_ktiled(x_ref, w1_ref, b1_ref, w2_ref, b2_ref, o_ref, acc_ref):
    # Hidden dimension tiled: grid = (token_tiles, hid_tiles); hid axis last.
    k = pl.program_id(1)

    @pl.when(k == 0)
    def _():
        acc_ref[...] = jnp.zeros_like(acc_ref)

    h = jnp.dot(x_ref[...], w1_ref[...], preferred_element_type=jnp.float32)
    h = jnp.maximum(h + b1_ref[...], 0.0)              # ReLU is per-hidden-col
    acc_ref[...] += jnp.dot(h.astype(w2_ref.dtype), w2_ref[...],
                            preferred_element_type=jnp.float32)

    @pl.when(k == pl.num_programs(1) - 1)
    def _():
        o_ref[...] = (acc_ref[...] + b2_ref[...]).astype(o_ref.dtype)


# ----------------------------- wrappers -------------------------------------


def prepare_ffn_params(w1, b1, w2, b2, compute_dtype=jnp.bfloat16):
    """Pad feature dims to multiples of 128 and cast weights to the MXU compute
    dtype ONCE (hoisted out of the per-forward-call path).  Biases stay f32."""
    d_in, d_hid = w1.shape
    assert w2.shape == (d_hid, d_in)
    d_in_p, d_hid_p = _round_up(d_in, 128), _round_up(d_hid, 128)
    w1_p = jnp.pad(w1, ((0, d_in_p - d_in), (0, d_hid_p - d_hid))).astype(compute_dtype)
    w2_p = jnp.pad(w2, ((0, d_hid_p - d_hid), (0, d_in_p - d_in))).astype(compute_dtype)
    b1_p = jnp.pad(b1, (0, d_hid_p - d_hid)).reshape(1, d_hid_p).astype(jnp.float32)
    b2_p = jnp.pad(b2, (0, d_in_p - d_in)).reshape(1, d_in_p).astype(jnp.float32)
    return dict(w1=w1_p, b1=b1_p, w2=w2_p, b2=b2_p,
                d_in=d_in, d_hid=d_hid, compute_dtype=compute_dtype)


def position_wise_ffn_prepared(x, params, *, max_tm=1024, max_tk=None,
                               force_ktiled=False):
    """x: (..., d_in) -> (..., d_in). `params` from prepare_ffn_params."""
    *lead, d_in = x.shape
    assert d_in == params["d_in"], "input feature dim mismatch"
    w1_p, b1_p, w2_p, b2_p = params["w1"], params["b1"], params["w2"], params["b2"]
    cdt = params["compute_dtype"]
    d_in_p, d_hid_p = w1_p.shape
    out_dtype = x.dtype

    m = 1
    for s in lead:
        m *= s

    x_item = jnp.dtype(cdt).itemsize
    w_item = jnp.dtype(cdt).itemsize
    o_item = jnp.dtype(out_dtype).itemsize
    budget = _vmem_budget_bytes()

    # Resident weights/biases (single-buffered via pl.Buffered(1)).
    weight_bytes = 2 * d_in_p * d_hid_p * w_item + (d_in_p + d_hid_p) * 4
    # Per-token-row VMEM of the fused kernel:
    #   x tile (x2 bufs) + out tile (x2) + h f32 + h compute-dtype copy + y f32
    per_row = (2 * d_in_p * x_item + 2 * d_in_p * o_item
               + d_hid_p * 4 + d_hid_p * w_item + d_in_p * 4)

    m_p128 = _round_up(max(m, 1), 128)
    n128 = m_p128 // 128

    fits_resident = (not force_ktiled
                     and weight_bytes <= budget // 2
                     and (budget - weight_bytes) >= 128 * per_row)

    x2d = x.reshape(m, d_in).astype(cdt)

    cost = pl.CostEstimate(
        flops=4 * m_p128 * d_in_p * d_hid_p,           # two matmuls
        transcendentals=0,
        bytes_accessed=int(m_p128 * d_in_p * (x_item + o_item)
                           + 2 * d_in_p * d_hid_p * w_item),
    )
    cparams = dict(vmem_limit_bytes=budget)

    if fits_resident:
        # --- weights-resident path: split tokens into near-equal tiles -------
        tm_budget_128 = (budget - weight_bytes) // (128 * per_row)
        tm_target_128 = max(1, min(max_tm // 128, tm_budget_128))
        grid_n = _cdiv(n128, tm_target_128)
        if n128 >= 2:
            grid_n = max(grid_n, 2)       # keep both v7x TensorCores busy
        tm_128 = _cdiv(n128, grid_n)
        tm_eff = tm_128 * 128
        m_pad = grid_n * tm_eff

        if (m_pad, d_in_p) != (m, d_in):
            x2d = jnp.pad(x2d, ((0, m_pad - m), (0, d_in_p - d_in)))

        out2d = pl.pallas_call(
            _ffn_kernel_fused,
            out_shape=jax.ShapeDtypeStruct((m_pad, d_in_p), out_dtype),
            grid_spec=pltpu.PrefetchScalarGridSpec(
                num_scalar_prefetch=0,
                grid=(grid_n,),
                in_specs=[
                    pl.BlockSpec((tm_eff, d_in_p), lambda i: (i, 0)),
                    _const_spec((d_in_p, d_hid_p)),
                    _const_spec((1, d_hid_p)),
                    _const_spec((d_hid_p, d_in_p)),
                    _const_spec((1, d_in_p)),
                ],
                out_specs=pl.BlockSpec((tm_eff, d_in_p), lambda i: (i, 0)),
            ),
            compiler_params=pltpu.CompilerParams(
                dimension_semantics=("parallel",), **cparams),
            cost_estimate=cost,
        )(x2d, w1_p, b1_p, w2_p, b2_p)
    else:
        # --- hidden-dim (K)-tiled fallback: weights too big to stay resident -
        def k_footprint(tm, tk):
            return (2 * tm * d_in_p * x_item + 2 * tm * d_in_p * o_item
                    + tm * d_in_p * 4                       # f32 accumulator
                    + 2 * d_in_p * tk * w_item + 2 * tk * d_in_p * w_item
                    + 2 * tk * 4 + d_in_p * 4               # bias slices
                    + tm * tk * 4 + tm * tk * w_item)       # h f32 + h cast

        tm_eff = min(512, m_p128)
        tk_start = d_hid_p if max_tk is None else max(
            128, min(d_hid_p, _round_up(max_tk, 128)))
        tk_eff = 128
        found = False
        for cand in range(tk_start, 0, -128):
            if k_footprint(tm_eff, cand) <= budget:
                tk_eff, found = cand, True
                break
        if not found:
            while tm_eff > 128 and k_footprint(tm_eff, 128) > budget:
                tm_eff -= 128
            # TODO(synk): extreme d_in widths would additionally need output
            # (N) tiling; not required at transformer FFN sizes.

        grid_m = _cdiv(m_p128, tm_eff)
        m_pad = grid_m * tm_eff
        grid_k = _cdiv(d_hid_p, tk_eff)
        d_hid_pp = grid_k * tk_eff
        if d_hid_pp != d_hid_p:  # rare re-pad; only on the fallback path
            w1_p = jnp.pad(w1_p, ((0, 0), (0, d_hid_pp - d_hid_p)))
            w2_p = jnp.pad(w2_p, ((0, d_hid_pp - d_hid_p), (0, 0)))
            b1_p = jnp.pad(b1_p, ((0, 0), (0, d_hid_pp - d_hid_p)))
        if (m_pad, d_in_p) != (m, d_in):
            x2d = jnp.pad(x2d, ((0, m_pad - m), (0, d_in_p - d_in)))

        out2d = pl.pallas_call(
            _ffn_kernel_ktiled,
            out_shape=jax.ShapeDtypeStruct((m_pad, d_in_p), out_dtype),
            grid_spec=pltpu.PrefetchScalarGridSpec(
                num_scalar_prefetch=0,
                grid=(grid_m, grid_k),
                in_specs=[
                    pl.BlockSpec((tm_eff, d_in_p), lambda i, k: (i, 0)),
                    pl.BlockSpec((d_in_p, tk_eff), lambda i, k: (0, k)),
                    pl.BlockSpec((1, tk_eff), lambda i, k: (0, k)),
                    pl.BlockSpec((tk_eff, d_in_p), lambda i, k: (k, 0)),
                    _const_spec((1, d_in_p)),
                ],
                out_specs=pl.BlockSpec((tm_eff, d_in_p), lambda i, k: (i, 0)),
                scratch_shapes=[pltpu.VMEM((tm_eff, d_in_p), jnp.float32)],
            ),
            compiler_params=pltpu.CompilerParams(
                dimension_semantics=("parallel", "arbitrary"), **cparams),
            cost_estimate=cost,
        )(x2d, w1_p, b1_p, w2_p, b2_p)

    if (out2d.shape[0], out2d.shape[1]) != (m, d_in):
        out2d = out2d[:m, :d_in]
    return out2d.reshape(*lead, d_in)


def position_wise_ffn(x, w1, b1, w2, b2, *, compute_dtype=jnp.bfloat16):
    """One-shot convenience wrapper. For repeated calls, run
    prepare_ffn_params once and call position_wise_ffn_prepared per step."""
    params = prepare_ffn_params(w1, b1, w2, b2, compute_dtype)
    return position_wise_ffn_prepared(x, params)


def _init_linear(key, fan_in, fan_out, dtype=jnp.float32):
    """nn.Linear-style init U(-1/sqrt(fan_in), 1/sqrt(fan_in)); weight returned
    in (fan_in, fan_out) layout (already transposed for x @ W)."""
    kw, kb = jax.random.split(key)
    bound = 1.0 / (fan_in ** 0.5)
    w = jax.random.uniform(kw, (fan_in, fan_out), dtype, -bound, bound)
    b = jax.random.uniform(kb, (fan_out,), dtype, -bound, bound)
    return w, b


if __name__ == "__main__":
    # Small shapes consistent with the module: ffn_num_input=32, ffn_num_hiddens=64.
    batch, seq = 2, 8
    ffn_num_input, ffn_num_hiddens = 32, 64

    key = jax.random.PRNGKey(0)
    kx, k1, k2 = jax.random.split(key, 3)

    x = jax.random.normal(kx, (batch, seq, ffn_num_input), jnp.float32)
    w1, b1 = _init_linear(k1, ffn_num_input, ffn_num_hiddens)
    w2, b2 = _init_linear(k2, ffn_num_hiddens, ffn_num_input)

    params = prepare_ffn_params(w1, b1, w2, b2)
    y = jax.block_until_ready(position_wise_ffn_prepared(x, params))
    assert y.shape == (batch, seq, ffn_num_input)

    # Reference with the same bf16 operand quantization the kernel uses
    # (bf16 operands, f32 accumulation, bf16 hidden activation).
    cdt = jnp.bfloat16
    h_ref = jnp.maximum(
        jnp.dot(x.astype(cdt), w1.astype(cdt),
                preferred_element_type=jnp.float32) + b1, 0.0)
    ref = jnp.dot(h_ref.astype(cdt), w2.astype(cdt),
                  preferred_element_type=jnp.float32) + b2
    assert jnp.allclose(y, ref, atol=1e-2, rtol=1e-2)

    # Also sanity-check against the pure-f32 PyTorch-equivalent reference.
    ref_f32 = jnp.maximum(x @ w1 + b1, 0.0) @ w2 + b2
    assert jnp.allclose(y, ref_f32, atol=5e-2, rtol=5e-2)

    # Exercise the hidden-dim (K)-tiled fallback path on TPU as well
    # (d_hid=200 -> padded 256, tk capped at 128 -> 2 reduction steps).
    w1b, b1b = _init_linear(k1, ffn_num_input, 200)
    w2b, b2b = _init_linear(k2, 200, ffn_num_input)
    params_b = prepare_ffn_params(w1b, b1b, w2b, b2b)
    y_kt = jax.block_until_ready(
        position_wise_ffn_prepared(x, params_b, force_ktiled=True, max_tk=128))
    h_ref_b = jnp.maximum(
        jnp.dot(x.astype(cdt), w1b.astype(cdt),
                preferred_element_type=jnp.float32) + b1b, 0.0)
    ref_b = jnp.dot(h_ref_b.astype(cdt), w2b.astype(cdt),
                    preferred_element_type=jnp.float32) + b2b
    assert jnp.allclose(y_kt, ref_b, atol=1e-2, rtol=1e-2)

    print("KERNEL_OK")
</pallas_src>

<mosaic_0001>
module attributes {stable_mosaic.version = 11 : i64} {
  func.func @_ffn_kernel_fused(%arg0: i32, %arg1: memref<128x128xbf16, #tpu.memory_space<vmem>>, %arg2: memref<128x128xbf16, #tpu.memory_space<vmem>>, %arg3: memref<1x128xf32, #tpu.memory_space<vmem>>, %arg4: memref<128x128xbf16, #tpu.memory_space<vmem>>, %arg5: memref<1x128xf32, #tpu.memory_space<vmem>>, %arg6: memref<128x128xf32, #tpu.memory_space<vmem>>) attributes {dimension_semantics = [#tpu.dimension_semantics<parallel>], iteration_bounds = array<i64: 1>, scalar_prefetch = 0 : i64, scratch_operands = 0 : i64, tpu.core_type = #tpu.core_type<tc>, window_params = [{transform_indices = @transform_0, window_bounds = array<i64: 128, 128>}, {pipeline_mode = #tpu.pipeline_mode<synchronous>, transform_indices = @transform_1, window_bounds = array<i64: 128, 128>}, {pipeline_mode = #tpu.pipeline_mode<synchronous>, transform_indices = @transform_2, window_bounds = array<i64: 1, 128>}, {pipeline_mode = #tpu.pipeline_mode<synchronous>, transform_indices = @transform_3, window_bounds = array<i64: 128, 128>}, {pipeline_mode = #tpu.pipeline_mode<synchronous>, transform_indices = @transform_4, window_bounds = array<i64: 1, 128>}, {transform_indices = @transform_5, window_bounds = array<i64: 128, 128>}]} {
    %c0 = arith.constant 0 : index
    %c0_0 = arith.constant 0 : index
    %0 = vector.load %arg1[%c0, %c0_0] : memref<128x128xbf16, #tpu.memory_space<vmem>>, vector<128x128xbf16>
    %c0_1 = arith.constant 0 : index
    %c0_2 = arith.constant 0 : index
    %1 = vector.load %arg2[%c0_1, %c0_2] : memref<128x128xbf16, #tpu.memory_space<vmem>>, vector<128x128xbf16>
    %cst = arith.constant dense<0.000000e+00> : vector<128x128xf32>
    %2 = tpu.matmul %0, %1, %cst {dimension_numbers = #tpu.dot_dimension_numbers<[1], [0], [0], [1], [0, 0, 1, 1], [], []>} : vector<128x128xbf16>, vector<128x128xbf16>, vector<128x128xf32> -> vector<128x128xf32>
    %c0_3 = arith.constant 0 : index
    %c0_4 = arith.constant 0 : index
    %3 = vector.load %arg3[%c0_3, %c0_4] : memref<1x128xf32, #tpu.memory_space<vmem>>, vector<1x128xf32>
    %4 = vector.broadcast %3 : vector<1x128xf32> to vector<128x128xf32>
    %5 = arith.addf %2, %4 : vector<128x128xf32>
    %cst_5 = arith.constant 0.000000e+00 : f32
    %6 = vector.broadcast %cst_5 : f32 to vector<128x128xf32>
    %7 = arith.maximumf %5, %6 : vector<128x128xf32>
    %8 = arith.truncf %7 : vector<128x128xf32> to vector<128x128xbf16>
    %c0_6 = arith.constant 0 : index
    %c0_7 = arith.constant 0 : index
    %9 = vector.load %arg4[%c0_6, %c0_7] : memref<128x128xbf16, #tpu.memory_space<vmem>>, vector<128x128xbf16>
    %cst_8 = arith.constant dense<0.000000e+00> : vector<128x128xf32>
    %10 = tpu.matmul %8, %9, %cst_8 {dimension_numbers = #tpu.dot_dimension_numbers<[1], [0], [0], [1], [0, 0, 1, 1], [], []>} : vector<128x128xbf16>, vector<128x128xbf16>, vector<128x128xf32> -> vector<128x128xf32>
    %c0_9 = arith.constant 0 : index
    %c0_10 = arith.constant 0 : index
    %11 = vector.load %arg5[%c0_9, %c0_10] : memref<1x128xf32, #tpu.memory_space<vmem>>, vector<1x128xf32>
    %12 = vector.broadcast %11 : vector<1x128xf32> to vector<128x128xf32>
    %13 = arith.addf %10, %12 : vector<128x128xf32>
    %c0_11 = arith.constant 0 : index
    %c0_12 = arith.constant 0 : index
    %14 = vector.load %arg6[%c0_11, %c0_12] : memref<128x128xf32, #tpu.memory_space<vmem>>, vector<128x128xf32>
    tpu.vector_store %arg6[%c0_11, %c0_12], %13 {strides = array<i32>} : memref<128x128xf32, #tpu.memory_space<vmem>>, vector<128x128xf32>,
    return
  }
  func.func @transform_0(%arg0: i32) -> (i32, i32) {
    %c0_i32 = arith.constant 0 : i32
    %c0_i32_0 = arith.constant 0 : i32
    return %arg0, %c0_i32 : i32, i32
  }
  func.func @transform_1(%arg0: i32) -> (i32, i32) {
    %c0_i32 = arith.constant 0 : i32
    %c0_i32_0 = arith.constant 0 : i32
    %c0_i32_1 = arith.constant 0 : i32
    return %c0_i32, %c0_i32_0 : i32, i32
  }
  func.func @transform_2(%arg0: i32) -> (i32, i32) {
    %c0_i32 = arith.constant 0 : i32
    %c0_i32_0 = arith.constant 0 : i32
    %c0_i32_1 = arith.constant 0 : i32
    return %c0_i32, %c0_i32_0 : i32, i32
  }
  func.func @transform_3(%arg0: i32) -> (i32, i32) {
    %c0_i32 = arith.constant 0 : i32
    %c0_i32_0 = arith.constant 0 : i32
    %c0_i32_1 = arith.constant 0 : i32
    return %c0_i32, %c0_i32_0 : i32, i32
  }
  func.func @transform_4(%arg0: i32) -> (i32, i32) {
    %c0_i32 = arith.constant 0 : i32
    %c0_i32_0 = arith.constant 0 : i32
    %c0_i32_1 = arith.constant 0 : i32
    return %c0_i32, %c0_i32_0 : i32, i32
  }
  func.func @transform_5(%arg0: i32) -> (i32, i32) {
    %c0_i32 = arith.constant 0 : i32
    %c0_i32_0 = arith.constant 0 : i32
    return %arg0, %c0_i32 : i32, i32
  }
}

</mosaic_0001>

<bundles_post_ra>
// kernel: tpu_custom_call.1
= control target key start
LH: loop header
LB: loop body
LE: loop exit
PB: predicated region body
PF: predicated region fallthrough
CT: control target
= control target key end

     0   :  { %10 = vsyncpa [#allocation3], 0  ;;  %s877_s0 = inlined_call_operand.hbm [shape: bf16[128,128], index: 0, kind: input, shape index: {}]   ;;  %s878_s1 = inlined_call_operand.hbm [shape: bf16[128,128], index: 1, kind: input, shape index: {}]   ;;  %s879_s2 = inlined_call_operand.vmem [shape: f32[1,128], index: 2, kind: input, shape index: {}]   ;;  %s880_s3 = inlined_call_operand.hbm [shape: bf16[128,128], index: 3, kind: input, shape index: {}]   ;;  %s881_s4 = inlined_call_operand.vmem [shape: f32[1,128], index: 4, kind: input, shape index: {}]   ;;  %s882_s5 = inlined_call_operand.hbm [shape: f32[128,128], index: 5, kind: output, shape index: {}]  }
   0x1   :  { %11 = vsyncpa [#allocation6], 0 }
   0x2   :  { %12 = vsyncpa [#allocation4], 0  ;;  %s769_s18 = smov [#allocation5]   ;;  %s770_s20 = smov [#allocation2]  }
   0x3   :  { %s30_s19 = sshll.u32 %s769_s18, 4  ;;  %s18_s21 = sshll.u32 %s770_s20, 4  ;;  %s31_s19 = int_to_ptr.vmem [resolvable:$true] %s30_s19  ;;  %s807_s21 = int_to_ptr.vmem [resolvable:$true] %s18_s21 }
   0x4   :  { %s675_s24 = scalar_lea.hbm %s878_s1, 1024 }
   0x5   :  { %p676_p0 = scmp.ne.s32.totalorder %s878_s1, %s675_s24  ;;  %p679_p1 = scmp.lt.u32.totalorder %s675_s24, %s878_s1 }
   0x7   :  { %p681_p2 = pnand %p679_p1, %p676_p0 }
   0x9   :  { %684 = shalt.err (!%p681_p2)
}
   0xa   :  { %s685_s29 = scalar_lea.vmem %s31_s19, 1024  ;;  %p690_p4 = scmp.lt.s32.totalorder %s31_s19, %s31_s19 }
   0xb   :  { %p686_p3 = scmp.ne.s32.totalorder %s31_s19, %s685_s29  ;;  %p691_p5 = scmp.lt.s32.totalorder %s685_s29, %s685_s29 }
   0xd   :  { %p692_p6 = por %p691_p5, %p690_p4 }
   0xf   :  { %p693_p7 = pnand %p692_p6, %p686_p3 }
  0x11   :  { %696 = shalt.err (!%p693_p7)
}
  0x12   :  { %s771_s30 = smov 64   ;;  %s772_s6 = smov 4  }
  0x13   :  { %36 = dma.hbm_to_vmem [thread:$0]  %s878_s1, 1024, %s31_s19, [#allocation6], %s771_s30, %s771_s30, %s772_s6  }
  0x14   :  { %s697_s11 = scalar_lea.hbm %s877_s0, 1024 }
  0x15   :  { %p698_p8 = scmp.ne.s32.totalorder %s877_s0, %s697_s11  ;;  %p701_p9 = scmp.lt.u32.totalorder %s697_s11, %s877_s0 }
  0x17   :  { %p703_p10 = pnand %p701_p9, %p698_p8 }
  0x19   :  { %706 = shalt.err (!%p703_p10)
}
  0x1a   :  { %s707_s16 = scalar_lea.vmem %s807_s21, 1024  ;;  %p712_p12 = scmp.lt.s32.totalorder %s807_s21, %s807_s21 }
  0x1b   :  { %p708_p11 = scmp.ne.s32.totalorder %s807_s21, %s707_s16  ;;  %p713_p13 = scmp.lt.s32.totalorder %s707_s16, %s707_s16 }
  0x1d   :  { %p714_p0 = por %p713_p13, %p712_p12 }
  0x1f   :  { %p715_p1 = pnand %p714_p0, %p708_p11 }
  0x21   :  { %718 = shalt.err (!%p715_p1)
}
  0x22   :  { %24 = dma.hbm_to_vmem [thread:$0]  %s877_s0, 1024, %s807_s21, [#allocation3], %s771_s30, %s771_s30, %s772_s6  }
  0x23   :  { %s773_s18 = smov [#allocation7]   ;;  %s719_s23 = scalar_lea.hbm %s880_s3, 1024 }
  0x24   :  { %s44_s19 = sshll.u32 %s773_s18, 4  ;;  %p720_p2 = scmp.ne.s32.totalorder %s880_s3, %s719_s23  ;;  %s45_s19 = int_to_ptr.vmem [resolvable:$true] %s44_s19 }
  0x25   :  { %p723_p3 = scmp.lt.u32.totalorder %s719_s23, %s880_s3 }
  0x27   :  { %p725_p4 = pnand %p723_p3, %p720_p2 }
  0x29   :  { %728 = shalt.err (!%p725_p4)
}
  0x2a   :  { %s729_s28 = scalar_lea.vmem %s45_s19, 1024  ;;  %p734_p6 = scmp.lt.s32.totalorder %s45_s19, %s45_s19 }
  0x2b   :  { %p730_p5 = scmp.ne.s32.totalorder %s45_s19, %s729_s28  ;;  %p735_p7 = scmp.lt.s32.totalorder %s729_s28, %s729_s28 }
  0x2d   :  { %p736_p8 = por %p735_p7, %p734_p6 }
  0x2f   :  { %p737_p9 = pnand %p736_p8, %p730_p5 }
  0x31   :  { %740 = shalt.err (!%p737_p9)
}
  0x32   :  { %50 = dma.hbm_to_vmem [thread:$0]  %s880_s3, 1024, %s45_s19, [#allocation6], %s771_s30, %s771_s30, %s772_s6  }
  0x33   :  { %763 = dma.done.wait [#allocation3], 1024  }
  0x34   :  { %764 = vsyncadd [#allocation3], 4294966272 }
  0x35   :  { %765 = dma.done.wait [#allocation6], 2048  }
  0x36   :  { %766 = vsyncadd [#allocation6], 4294965248  ;;  %v651_v0 = vld [vmem:[#allocation5] sm:$0xff]   ;;  %v652_v1 = vld [vmem:[#allocation5 + $0x8] sm:$0xff]  }
  0x37   :  { %579 = vmatprep.subr.bf16.mxu0 %v651_v0  ;;  %v653_v2 = vld [vmem:[#allocation5 + $0x10] sm:$0xff]   ;;  %v654_v3 = vld [vmem:[#allocation5 + $0x18] sm:$0xff]   ;;  %v659_v4 = vld [vmem:[#allocation2] sm:$0xff]  }
  0x38   :  { %580 = vmatpush3.bf16.msra.mxu0 %v651_v0  ;;  %595 = vmatprep.mubr.bf16.mxu0 %v659_v4  ;;  %v655_v5 = vld [vmem:[#allocation5 + $0x20] sm:$0xff]   ;;  %v656_v6 = vld [vmem:[#allocation5 + $0x28] sm:$0xff]   ;;  %v657_v9 = vld [vmem:[#allocation5 + $0x30] sm:$0xff]  }
  0x39   :  { %581 = vmatprep.subr.bf16.mxu0 %v652_v1  ;;  %v667_v7 = vld [vmem:[#allocation7] sm:$0xff]   ;;  %v668_v8 = vld [vmem:[#allocation7 + $0x8] sm:$0xff]   ;;  %v669_v10 = vld [vmem:[#allocation7 + $0x10] sm:$0xff]  }
  0x3a   :  { %611 = vmatprep.subr.bf16.mxu1 %v667_v7  ;;  %v658_v11 = vld [vmem:[#allocation5 + $0x38] sm:$0xff]   ;;  %v671_v13 = vld [vmem:[#allocation7 + $0x20] sm:$0xff]   ;;  %v660_v14 = vld [vmem:[#allocation2 + $0x8] sm:$0xff]  }
  0x3b   :  { %612 = vmatpush3.bf16.msra.mxu1 %v667_v7  ;;  %v670_v12 = vld [vmem:[#allocation7 + $0x18] sm:$0xff]   ;;  %v661_v15 = vld [vmem:[#allocation2 + $0x10] sm:$0xff]   ;;  %v672_v16 = vld [vmem:[#allocation7 + $0x28] sm:$0xff]  }
  0x3c   :  { %582 = vmatpush3.bf16.msra.mxu0 %v652_v1  ;;  %613 = vmatprep.subr.bf16.mxu1 %v668_v8  ;;  %v662_v17 = vld [vmem:[#allocation2 + $0x18] sm:$0xff]   ;;  %v663_v18 = vld [vmem:[#allocation2 + $0x20] sm:$0xff]   ;;  %v664_v19 = vld [vmem:[#allocation2 + $0x28] sm:$0xff]  }
  0x3d   :  { %583 = vmatprep.subr.bf16.mxu0 %v653_v2  ;;  %v665_v20 = vld [vmem:[#allocation2 + $0x30] sm:$0xff]   ;;  %v666_v21 = vld [vmem:[#allocation2 + $0x38] sm:$0xff]   ;;  %v521_v24 = vld [vmem:[%s879_s2] ss:$0 sm:$0xff] }
  0x3e   :  { %v673_v22 = vld [vmem:[#allocation7 + $0x30] sm:$0xff]   ;;  %v674_v23 = vld [vmem:[#allocation7 + $0x38] sm:$0xff]  }
  0x3f   :  { %614 = vmatpush3.bf16.msra.mxu1 %v668_v8 }
  0x40   :  { %584 = vmatpush3.bf16.msra.mxu0 %v653_v2  ;;  %615 = vmatprep.subr.bf16.mxu1 %v669_v10 }
  0x41   :  { %585 = vmatprep.subr.bf16.mxu0 %v654_v3 }
  0x43   :  { %616 = vmatpush3.bf16.msra.mxu1 %v669_v10 }
  0x44   :  { %586 = vmatpush3.bf16.msra.mxu0 %v654_v3  ;;  %617 = vmatprep.subr.bf16.mxu1 %v670_v12 }
  0x45   :  { %587 = vmatprep.subr.bf16.mxu0 %v655_v5 }
  0x47   :  { %618 = vmatpush3.bf16.msra.mxu1 %v670_v12 }
  0x48   :  { %588 = vmatpush3.bf16.msra.mxu0 %v655_v5  ;;  %619 = vmatprep.subr.bf16.mxu1 %v671_v13 }
  0x49   :  { %589 = vmatprep.subr.bf16.mxu0 %v656_v6 }
  0x4b   :  { %620 = vmatpush3.bf16.msra.mxu1 %v671_v13 }
  0x4c   :  { %590 = vmatpush3.bf16.msra.mxu0 %v656_v6  ;;  %621 = vmatprep.subr.bf16.mxu1 %v672_v16 }
  0x4d   :  { %591 = vmatprep.subr.bf16.mxu0 %v657_v9 }
  0x4f   :  { %622 = vmatpush3.bf16.msra.mxu1 %v672_v16 }
  0x50   :  { %592 = vmatpush3.bf16.msra.mxu0 %v657_v9  ;;  %623 = vmatprep.subr.bf16.mxu1 %v673_v22 }
  0x51   :  { %593 = vmatprep.subr.bf16.mxu0 %v658_v11 }
  0x53   :  { %624 = vmatpush3.bf16.msra.mxu1 %v673_v22 }
  0x54   :  { %594 = vmatpush3.bf16.msra.mxu0 %v658_v11  ;;  %625 = vmatprep.subr.bf16.mxu1 %v674_v23 }
  0x57   :  { %596 = vmatmul.mubr.bf16.vlgmr.msra.gmra.mrb[0].mxu0 %v660_v14  ;;  %626 = vmatpush3.bf16.msra.mxu1 %v674_v23 }
  0x58   :  { %599 = vmatprep.mubr.bf16.mxu0 %v661_v15 }
  0x5f   :  { %600 = vmatmul.mubr.bf16.gmra.mrb[4].mxu0 %v662_v17  ;;  %v538_v17 = vld [vmem:[%s881_s4] ss:$0 sm:$0xff]  ;;  %s774_s4 = smov [#allocation8]  }
  0x60   :  { %603 = vmatprep.mubr.bf16.mxu0 %v663_v18  ;;  %s508_s6 = sshll.u32 %s774_s4, 4  ;;  %s509_s6 = int_to_ptr.vmem [resolvable:$true] %s508_s6 }
  0x61   :  { %s741_s7 = scalar_lea.vmem %s509_s6, 2048  ;;  %p746_p11 = scmp.lt.s32.totalorder %s509_s6, %s509_s6 }
  0x62   :  { %p742_p10 = scmp.ne.s32.totalorder %s509_s6, %s741_s7  ;;  %p747_p12 = scmp.lt.s32.totalorder %s741_s7, %s741_s7 }
  0x64   :  { %p748_p13 = por %p747_p12, %p746_p11 }
  0x66   :  { %p749_p0 = pnand %p748_p13, %p742_p10 }
  0x67   :  { %604 = vmatmul.mubr.bf16.gmra.mrb[8].mxu0 %v664_v19 }
  0x68   :  { %607 = vmatprep.mubr.bf16.mxu0 %v665_v20 }
  0x6f   :  { %608 = vmatmul.mubr.bf16.gmra.mrb[12].mxu0 %v666_v21 }
 0x12a   :  { %v597_v25 = vpop.f32.mrb[0].mxu0 }
 0x12b   :  { %v241_v26 = vadd.f32 %v597_v25, %v521_v24  ;;  %v232_v27 = vpop.f32.mrb[1].mxu0 }
 0x12c   :  { %v233_v28 = vadd.f32 %v521_v24, %v232_v27  ;;  %v598_v29 = vpop.f32.mrb[2].mxu0 }
 0x12d   :  { %v244_v30 = vadd.f32 %v598_v29, %v521_v24  ;;  %v235_v31 = vpop.f32.mrb[3].mxu0  ;;  %v297_v33 = vmax.f32 %v241_v26, 0.0 }
 0x12e   :  { %v236_v32 = vadd.f32 %v521_v24, %v235_v31  ;;  %v295_v35 = vmax.f32 %v233_v28, 0.0 }
 0x12f   :  { %v298_v34 = vmax.f32 %v244_v30, 0.0 }
 0x130   :  { %v296_v36 = vmax.f32 %v236_v32, 0.0 }
 0x131   :  { %v312_v37 = vpack.c.bf16 %v298_v34, %v297_v33 }
 0x132   :  { %v601_v38 = vpop.f32.mrb[4].mxu0  ;;  %v311_v39 = vpack.c.bf16 %v296_v36, %v295_v35 }
 0x133   :  { %v257_v40 = vadd.f32 %v601_v38, %v521_v24  ;;  %v248_v41 = vpop.f32.mrb[5].mxu0 }
 0x134   :  { %v249_v42 = vadd.f32 %v521_v24, %v248_v41  ;;  %v602_v43 = vpop.f32.mrb[6].mxu0  ;;  %627 = vmatprep.mubr.bf16.mxu1 %v311_v39 }
 0x135   :  { %v260_v44 = vadd.f32 %v602_v43, %v521_v24  ;;  %v251_v45 = vpop.f32.mrb[7].mxu0  ;;  %628 = vmatmul.mubr.bf16.vlgmr.msra.gmra.mrb[0].mxu1 %v312_v37  ;;  %v301_v47 = vmax.f32 %v257_v40, 0.0 }
 0x136   :  { %v252_v46 = vadd.f32 %v521_v24, %v251_v45  ;;  %v299_v49 = vmax.f32 %v249_v42, 0.0 }
 0x137   :  { %v302_v48 = vmax.f32 %v260_v44, 0.0 }
 0x138   :  { %v300_v50 = vmax.f32 %v252_v46, 0.0 }
 0x139   :  { %v314_v51 = vpack.c.bf16 %v302_v48, %v301_v47 }
 0x13a   :  { %v313_v52 = vpack.c.bf16 %v300_v50, %v299_v49  ;;  %v605_v53 = vpop.f32.mrb[8].mxu0 }
 0x13b   :  { %v273_v54 = vadd.f32 %v605_v53, %v521_v24  ;;  %v264_v55 = vpop.f32.mrb[9].mxu0 }
 0x13c   :  { %v265_v56 = vadd.f32 %v521_v24, %v264_v55  ;;  %v606_v57 = vpop.f32.mrb[10].mxu0  ;;  %631 = vmatprep.mubr.bf16.mxu1 %v313_v52 }
 0x13d   :  { %v276_v58 = vadd.f32 %v606_v57, %v521_v24  ;;  %v267_v59 = vpop.f32.mrb[11].mxu0  ;;  %632 = vmatmul.mubr.bf16.gmra.mrb[4].mxu1 %v314_v51  ;;  %v305_v61 = vmax.f32 %v273_v54, 0.0 }
 0x13e   :  { %v268_v60 = vadd.f32 %v521_v24, %v267_v59  ;;  %v303_v63 = vmax.f32 %v265_v56, 0.0 }
 0x13f   :  { %v306_v62 = vmax.f32 %v276_v58, 0.0 }
 0x140   :  { %v304_v0 = vmax.f32 %v268_v60, 0.0 }
 0x141   :  { %v316_v1 = vpack.c.bf16 %v306_v62, %v305_v61 }
 0x142   :  { %v315_v2 = vpack.c.bf16 %v304_v0, %v303_v63  ;;  %v609_v3 = vpop.f32.mrb[12].mxu0 }
 0x143   :  { %v289_v4 = vadd.f32 %v609_v3, %v521_v24  ;;  %v280_v5 = vpop.f32.mrb[13].mxu0 }
 0x144   :  { %v281_v6 = vadd.f32 %v521_v24, %v280_v5  ;;  %v610_v7 = vpop.f32.mrb[14].mxu0  ;;  %635 = vmatprep.mubr.bf16.mxu1 %v315_v2 }
 0x145   :  { %v292_v8 = vadd.f32 %v610_v7, %v521_v24  ;;  %v283_v9 = vpop.f32.mrb[15].mxu0  ;;  %636 = vmatmul.mubr.bf16.gmra.mrb[8].mxu1 %v316_v1  ;;  %v309_v11 = vmax.f32 %v289_v4, 0.0 }
 0x146   :  { %v284_v10 = vadd.f32 %v521_v24, %v283_v9  ;;  %v307_v13 = vmax.f32 %v281_v6, 0.0 }
 0x147   :  { %v310_v12 = vmax.f32 %v292_v8, 0.0 }
 0x148   :  { %v308_v14 = vmax.f32 %v284_v10, 0.0 }
 0x149   :  { %v318_v15 = vpack.c.bf16 %v310_v12, %v309_v11 }
 0x14a   :  { %v317_v16 = vpack.c.bf16 %v308_v14, %v307_v13 }
 0x14c   :  { %639 = vmatprep.mubr.bf16.mxu1 %v317_v16 }
 0x14d   :  { %640 = vmatmul.mubr.bf16.gmra.mrb[12].mxu1 %v318_v15 }
 0x208   :  { %v629_v18 = vpop.f32.mrb[0].mxu1 }
 0x209   :  { %v433_v19 = vadd.f32 %v629_v18, %v538_v17  ;;  %v424_v20 = vpop.f32.mrb[1].mxu1 }
 0x20a   :  { %v425_v21 = vadd.f32 %v538_v17, %v424_v20  ;;  %v630_v22 = vpop.f32.mrb[2].mxu1 }
 0x20b   :  { %489 = vst [vmem:[#allocation8 + $0x10] sm:$0xff] %v433_v19  ;;  %v436_v23 = vadd.f32 %v630_v22, %v538_v17  ;;  %v427_v24 = vpop.f32.mrb[3].mxu1 }
 0x20c   :  { %487 = vst [vmem:[#allocation8] sm:$0xff] %v425_v21  ;;  %v428_v25 = vadd.f32 %v538_v17, %v427_v24 }
 0x20d   :  { %490 = vst [vmem:[#allocation8 + $0x18] sm:$0xff] %v436_v23 }
 0x20e   :  { %488 = vst [vmem:[#allocation8 + $0x8] sm:$0xff] %v428_v25 }
 0x210   :  { %v633_v26 = vpop.f32.mrb[4].mxu1 }
 0x211   :  { %v449_v27 = vadd.f32 %v633_v26, %v538_v17  ;;  %v440_v28 = vpop.f32.mrb[5].mxu1 }
 0x212   :  { %v441_v29 = vadd.f32 %v538_v17, %v440_v28  ;;  %v634_v30 = vpop.f32.mrb[6].mxu1 }
 0x213   :  { %493 = vst [vmem:[#allocation8 + $0x30] sm:$0xff] %v449_v27  ;;  %v452_v31 = vadd.f32 %v634_v30, %v538_v17  ;;  %v443_v32 = vpop.f32.mrb[7].mxu1 }
 0x214   :  { %491 = vst [vmem:[#allocation8 + $0x20] sm:$0xff] %v441_v29  ;;  %v444_v33 = vadd.f32 %v538_v17, %v443_v32 }
 0x215   :  { %494 = vst [vmem:[#allocation8 + $0x38] sm:$0xff] %v452_v31 }
 0x216   :  { %492 = vst [vmem:[#allocation8 + $0x28] sm:$0xff] %v444_v33 }
 0x218   :  { %v637_v34 = vpop.f32.mrb[8].mxu1 }
 0x219   :  { %v465_v35 = vadd.f32 %v637_v34, %v538_v17  ;;  %v456_v36 = vpop.f32.mrb[9].mxu1 }
 0x21a   :  { %v457_v37 = vadd.f32 %v538_v17, %v456_v36  ;;  %v638_v38 = vpop.f32.mrb[10].mxu1 }
 0x21b   :  { %497 = vst [vmem:[#allocation8 + $0x50] sm:$0xff] %v465_v35  ;;  %v468_v39 = vadd.f32 %v638_v38, %v538_v17  ;;  %v459_v40 = vpop.f32.mrb[11].mxu1 }
 0x21c   :  { %495 = vst [vmem:[#allocation8 + $0x40] sm:$0xff] %v457_v37  ;;  %v460_v41 = vadd.f32 %v538_v17, %v459_v40 }
 0x21d   :  { %498 = vst [vmem:[#allocation8 + $0x58] sm:$0xff] %v468_v39 }
 0x21e   :  { %496 = vst [vmem:[#allocation8 + $0x48] sm:$0xff] %v460_v41 }
 0x220   :  { %v641_v42 = vpop.f32.mrb[12].mxu1 }
 0x221   :  { %v481_v43 = vadd.f32 %v641_v42, %v538_v17  ;;  %v472_v44 = vpop.f32.mrb[13].mxu1 }
 0x222   :  { %v473_v45 = vadd.f32 %v538_v17, %v472_v44  ;;  %v642_v46 = vpop.f32.mrb[14].mxu1 }
 0x223   :  { %501 = vst [vmem:[#allocation8 + $0x70] sm:$0xff] %v481_v43  ;;  %v484_v47 = vadd.f32 %v642_v46, %v538_v17  ;;  %v475_v48 = vpop.f32.mrb[15].mxu1 }
 0x224   :  { %499 = vst [vmem:[#allocation8 + $0x60] sm:$0xff] %v473_v45  ;;  %v476_v49 = vadd.f32 %v538_v17, %v475_v48 }
 0x225   :  { %502 = vst [vmem:[#allocation8 + $0x78] sm:$0xff] %v484_v47 }
 0x226   :  { %500 = vst [vmem:[#allocation8 + $0x68] sm:$0xff] %v476_v49 }
 0x227   :  { %752 = shalt.err (!%p749_p0)
}
 0x228   :  { %s753_s10 = scalar_lea.hbm %s882_s5, 2048 }
 0x229   :  { %p754_p1 = scmp.ne.s32.totalorder %s882_s5, %s753_s10  ;;  %p757_p2 = scmp.lt.u32.totalorder %s753_s10, %s882_s5 }
 0x22b   :  { %p759_p3 = pnand %p757_p2, %p754_p1 }
 0x22d   :  { %762 = shalt.err (!%p759_p3)
}
 0x22e   :  { %s775_s15 = smov 128   ;;  %s776_s16 = smov 8  }
 0x22f   :  { %514 = dma.vmem_to_hbm [thread:$0]  %s509_s6, 2048, %s882_s5, [#allocation4], %s775_s15, %s775_s15, %s776_s16  }
 0x230   :  { %767 = dma.done.wait [#allocation4], 2048  }
 0x231   :  { %768 = vsyncadd [#allocation4], 4294965248 }
 0x232   :  { %518 = vsyncpa [#allocation3], 1 }
 0x233   :  { %519 = vsyncpa [#allocation6], 1 }
 0x234   :  { %520 = vsyncpa [#allocation4], 1 }

</bundles_post_ra>
